<compile_context>
chip_gen: v7x
topology: tpu7x:2x2x1
jax: 0.10.0
libtpu: 0.0.40
codegen_flags: <defaults>
</compile_context>

<pallas_src>
import jax
import jax.numpy as jnp
import numpy as np
from jax import lax
from jax.experimental import pallas as pl
from jax.experimental.pallas import tpu as pltpu


def _round_up(x, m):
    return ((x + m - 1) // m) * m


def _make_pam_kernel(C, n_valid, n_pad, exp_dtype):
    def kernel(x_ref, k_ref, cvec_ref, v_ref, wq_ref, gamma_ref, out_ref):
        x_t = x_ref[0]                                                 # (C, TQ) f32

        # Query projection for this tile. bq is dropped: it only adds a per-row
        # constant to the energy, which softmax(dim=-1) is invariant to.
        q_t = jnp.dot(wq_ref[...], x_t,
                      preferred_element_type=jnp.float32)              # (KE, TQ)

        # energy[i, j] = sum_k q_t[k, i] * k_eff[k, j] + cvec[j]
        # (transposed lhs expressed via dot_general dims -> no XLU transpose)
        energy = lax.dot_general(
            q_t.astype(jnp.bfloat16), k_ref[0],
            dimension_numbers=(((0,), (0,)), ((), ())),
            preferred_element_type=jnp.float32)                        # (TQ, NP)
        energy = energy + cvec_ref[0]

        if n_pad != n_valid:                   # static branch: mask padded keys
            col = lax.broadcasted_iota(jnp.int32, energy.shape, 1)
            energy = jnp.where(col < n_valid, energy, -jnp.inf)

        # Row-wise softmax over keys; normalization deferred.
        m = jnp.max(energy, axis=-1, keepdims=True)                    # (TQ, 1)
        p = jnp.exp((energy - m).astype(exp_dtype))                    # (TQ, NP)

        # out_aug[c, i] = sum_j v_aug[c, j] * p[i, j]; row C of v_aug is all
        # ones, so out_aug[C] is the softmax row-sum for free on the MXU.
        out_aug = lax.dot_general(
            v_ref[0], p.astype(jnp.bfloat16),
            dimension_numbers=(((1,), (1,)), ((), ())),
            preferred_element_type=jnp.float32)                        # (CP, TQ)

        # gamma * softmax normalization folded into one tiny (1, TQ) scale.
        scale = gamma_ref[0] * pl.reciprocal(out_aug[C:C + 1, :], approx=True)
        out_ref[0] = out_aug[:C, :] * scale + x_t

    return kernel


def _vmem_cap_bytes():
    try:
        return int(pltpu.get_tpu_info().vmem_capacity_bytes)
    except Exception:
        return 64 * 1024 * 1024          # v7x (smallest physical VMEM) fallback


def _step_vmem_bytes(C, KE, CP, NP, tq, exp_bytes):
    # Double-buffered pipeline blocks.
    blocks = 2 * (C * tq * 4             # x query tile
                  + KE * NP * 2          # k_eff (bf16)
                  + NP * 4               # cvec
                  + CP * NP * 2          # v_aug (bf16, + ones row)
                  + C * tq * 4)          # output tile
    blocks += 2 * KE * C * 4             # wq_eff
    # In-kernel temporaries: energy (f32), p, bf16 copy of p, out_aug, result.
    temps = (tq * NP * 4 + tq * NP * exp_bytes + tq * NP * 2
             + CP * tq * 4 + C * tq * 4)
    return blocks + temps + (2 << 20)    # fudge for compiler-internal scratch


def _pick_tq(C, KE, CP, NP, exp_bytes, cap):
    budget = int(cap * 0.6)
    for tq in (1024, 512, 256, 128):
        if NP % tq == 0 and _step_vmem_bytes(C, KE, CP, NP, tq, exp_bytes) <= budget:
            return tq
    return 128


def _default_exp_dtype():
    # bf16 exp on chips with a bf16 EUP (v6e / v7x); f32 otherwise (v5e, v4).
    try:
        kind = jax.devices()[0].device_kind.lower()
    except Exception:
        return jnp.float32
    for old in ("v2", "v3", "v4", "v5"):
        if old in kind:
            return jnp.float32
    return jnp.bfloat16


def pam_forward(x, wq, bq, wk, bk, wv, bv, gamma, *, tq=None):
    """PAM_Module.forward.  x: (B, C, H, W); 1x1-conv weights given as (out, in)."""
    # bk shifts every energy row by a j-independent constant, and bq's
    # query-side contribution is also a per-row constant; both are
    # softmax(dim=-1)-invariant and dropped exactly. The only surviving bias
    # term is cvec[j] = (bq^T Wk x)[j].
    del bk

    B, C, H, W = x.shape
    N = H * W
    C8 = wq.shape[0]
    KE = max(_round_up(C8, 8), 8)      # sublane-aligned q/k channel count
    CP = _round_up(C + 1, 16)          # value rows + ones row, bf16-tile aligned
    NP = _round_up(N, 128)             # lane-aligned key/query count

    exp_dtype = _default_exp_dtype()
    exp_bytes = 2 if exp_dtype == jnp.bfloat16 else 4

    cap = _vmem_cap_bytes()
    if tq is None:
        tq = _pick_tq(C, KE, CP, NP, exp_bytes, cap)
    assert NP % tq == 0 and tq % 128 == 0, (N, NP, tq)

    x_flat = x.reshape(B, C, N).astype(jnp.float32)
    if NP != N:
        x_flat = jnp.pad(x_flat, ((0, 0), (0, 0), (0, NP - N)))

    # --- per-batch projections, hoisted to XLA (O(C^2*N) << O(N^2*C/8)) ------
    wq32 = wq.astype(jnp.float32)
    wk32 = wk.astype(jnp.float32)
    wq_eff = jnp.zeros((KE, C), jnp.float32).at[:C8].set(wq32)
    wk_eff = jnp.zeros((KE, C), jnp.float32).at[:C8].set(wk32)

    k_eff = jnp.einsum("kc,bcn->bkn", wk_eff, x_flat).astype(jnp.bfloat16)   # (B,KE,NP)
    cvec = jnp.einsum("c,bcn->bn", bq.astype(jnp.float32) @ wk32,
                      x_flat).reshape(B, 1, NP)                              # (B,1,NP)
    v = (jnp.einsum("oc,bcn->bon", wv.astype(jnp.float32), x_flat)
         + bv.astype(jnp.float32)[None, :, None])                            # (B,C,NP)
    pad_rows = [jnp.ones((B, 1, NP), jnp.float32)]                           # ones row
    if CP - C - 1 > 0:
        pad_rows.append(jnp.zeros((B, CP - C - 1, NP), jnp.float32))
    v_aug = jnp.concatenate([v] + pad_rows, axis=1).astype(jnp.bfloat16)     # (B,CP,NP)

    gamma1 = gamma.reshape(1).astype(jnp.float32)

    grid = (B, NP // tq)

    flops = int(B * (2 * KE * C * NP + 2 * KE * NP * NP + 2 * CP * NP * NP))
    bytes_accessed = int(B * NP * (C * 4 + KE * 2 + 4 + CP * 2 + C * 4) + KE * C * 4)
    cost = pl.CostEstimate(flops=flops, transcendentals=int(B * NP * NP),
                           bytes_accessed=bytes_accessed)

    vmem_limit = int(min(cap * 9 // 10,
                         max(2 * _step_vmem_bytes(C, KE, CP, NP, tq, exp_bytes),
                             32 * 1024 * 1024)))

    kernel = _make_pam_kernel(C, N, NP, exp_dtype)

    out_flat = pl.pallas_call(
        kernel,
        out_shape=jax.ShapeDtypeStruct((B, C, NP), jnp.float32),
        grid_spec=pltpu.PrefetchScalarGridSpec(
            num_scalar_prefetch=0,
            grid=grid,
            in_specs=[
                pl.BlockSpec((1, C, tq), lambda b, q: (b, 0, q)),    # x query tile
                pl.BlockSpec((1, KE, NP), lambda b, q: (b, 0, 0)),   # k_eff = Wk x
                pl.BlockSpec((1, 1, NP), lambda b, q: (b, 0, 0)),    # cvec = bq^T Wk x
                pl.BlockSpec((1, CP, NP), lambda b, q: (b, 0, 0)),   # [v ; ones ; 0]
                pl.BlockSpec((KE, C), lambda b, q: (0, 0)),          # Wq (padded)
                pl.BlockSpec(memory_space=pltpu.MemorySpace.SMEM),   # gamma scalar
            ],
            out_specs=pl.BlockSpec((1, C, tq), lambda b, q: (b, 0, q)),
        ),
        compiler_params=pltpu.CompilerParams(
            # Projections are precomputed, so there is no cross-step scratch
            # dependence: both axes are parallel (v7x megacore works at B=1).
            dimension_semantics=("parallel", "parallel"),
            vmem_limit_bytes=vmem_limit,
        ),
        cost_estimate=cost,
    )(x_flat, k_eff, cvec, v_aug, wq_eff, gamma1)

    if NP != N:
        out_flat = out_flat[:, :, :N]
    return out_flat.reshape(B, C, H, W)


def pam_reference(x, wq, bq, wk, bk, wv, bv, gamma):
    """Pure-JAX f32 reference mirroring the PyTorch forward."""
    B, C, H, W = x.shape
    N = H * W
    xf = x.reshape(B, C, N)
    q = jnp.einsum("oc,bcn->bon", wq, xf) + bq[None, :, None]    # (B, C8, N)
    k = jnp.einsum("oc,bcn->bon", wk, xf) + bk[None, :, None]    # (B, C8, N)
    v = jnp.einsum("oc,bcn->bon", wv, xf) + bv[None, :, None]    # (B, C, N)
    energy = jnp.einsum("bci,bcj->bij", q, k)                    # (B, N, N)
    m = jnp.max(energy, axis=-1, keepdims=True)
    e = jnp.exp(energy - m)
    attn = e / jnp.sum(e, axis=-1, keepdims=True)
    out = jnp.einsum("bcj,bij->bci", v, attn)                    # (B, C, N)
    out = gamma[0] * out + xf
    return out.reshape(B, C, H, W)


if __name__ == "__main__":
    B, C, H, W = 2, 16, 16, 16          # in_dim=16 -> query/key channels = 2
    C8 = C // 8

    key = jax.random.PRNGKey(0)
    kx, kwq, kbq, kwk, kbk, kwv, kbv = jax.random.split(key, 7)

    x = jax.random.normal(kx, (B, C, H, W), dtype=jnp.float32)
    wq = jax.random.normal(kwq, (C8, C), dtype=jnp.float32) * 0.1
    bq = jax.random.normal(kbq, (C8,), dtype=jnp.float32) * 0.1
    wk = jax.random.normal(kwk, (C8, C), dtype=jnp.float32) * 0.1
    bk = jax.random.normal(kbk, (C8,), dtype=jnp.float32) * 0.1
    wv = jax.random.normal(kwv, (C, C), dtype=jnp.float32) * 0.1
    bv = jax.random.normal(kbv, (C,), dtype=jnp.float32) * 0.1
    # PyTorch inits gamma=0 (which would make out == x); use 0.5 so the
    # attention path is actually exercised / verified.
    gamma = jnp.array([0.5], dtype=jnp.float32)

    # tq=128 -> N=256 splits into 2 query tiles, exercising the tiled grid.
    out = pam_forward(x, wq, bq, wk, bk, wv, bv, gamma, tq=128)
    out = jax.block_until_ready(out)

    ref = pam_reference(x, wq, bq, wk, bk, wv, bv, gamma)
    # bf16 MXU inputs (f32 accumulation), optional bf16 exp and approx
    # reciprocal vs a pure-f32 reference.
    np.testing.assert_allclose(np.asarray(out), np.asarray(ref),
                               rtol=1e-2, atol=1e-2)

    print("KERNEL_OK")
</pallas_src>

<mosaic_0001>
module attributes {stable_mosaic.version = 11 : i64} {
  func.func @kernel(%arg0: i32, %arg1: i32, %arg2: memref<1x16x128xf32, #tpu.memory_space<vmem>>, %arg3: memref<1x8x256xbf16, #tpu.memory_space<vmem>>, %arg4: memref<1x1x256xf32, #tpu.memory_space<vmem>>, %arg5: memref<1x32x256xbf16, #tpu.memory_space<vmem>>, %arg6: memref<8x16xf32, #tpu.memory_space<vmem>>, %arg7: memref<1xf32, #tpu.memory_space<smem>>, %arg8: memref<1x16x128xf32, #tpu.memory_space<vmem>>) attributes {dimension_semantics = [#tpu.dimension_semantics<parallel>, #tpu.dimension_semantics<parallel>], iteration_bounds = array<i64: 2, 2>, scalar_prefetch = 0 : i64, scratch_operands = 0 : i64, tpu.core_type = #tpu.core_type<tc>, window_params = [{transform_indices = @transform_0, window_bounds = array<i64: 1, 16, 128>}, {transform_indices = @transform_1, window_bounds = array<i64: 1, 8, 256>}, {transform_indices = @transform_2, window_bounds = array<i64: 1, 1, 256>}, {transform_indices = @transform_3, window_bounds = array<i64: 1, 32, 256>}, {pipeline_mode = #tpu.pipeline_mode<synchronous>, transform_indices = @transform_4, window_bounds = array<i64: 8, 16>}, {transform_indices = @transform_5, window_bounds = array<i64: 1>}, {transform_indices = @transform_6, window_bounds = array<i64: 1, 16, 128>}]} {
    %c0 = arith.constant 0 : index
    %c0_0 = arith.constant 0 : index
    %c0_1 = arith.constant 0 : index
    %0 = vector.load %arg2[%c0, %c0_0, %c0_1] : memref<1x16x128xf32, #tpu.memory_space<vmem>>, vector<1x16x128xf32>
    %1 = vector.shape_cast %0 : vector<1x16x128xf32> to vector<16x128xf32>
    %c0_2 = arith.constant 0 : index
    %c0_3 = arith.constant 0 : index
    %2 = vector.load %arg6[%c0_2, %c0_3] : memref<8x16xf32, #tpu.memory_space<vmem>>, vector<8x16xf32>
    %cst = arith.constant dense<0.000000e+00> : vector<8x128xf32>
    %3 = tpu.matmul %2, %1, %cst {dimension_numbers = #tpu.dot_dimension_numbers<[1], [0], [0], [1], [0, 0, 1, 1], [], []>} : vector<8x16xf32>, vector<16x128xf32>, vector<8x128xf32> -> vector<8x128xf32>
    %4 = arith.truncf %3 : vector<8x128xf32> to vector<8x128xbf16>
    %c0_4 = arith.constant 0 : index
    %c0_5 = arith.constant 0 : index
    %c0_6 = arith.constant 0 : index
    %5 = vector.load %arg3[%c0_4, %c0_5, %c0_6] : memref<1x8x256xbf16, #tpu.memory_space<vmem>>, vector<1x8x256xbf16>
    %6 = vector.shape_cast %5 : vector<1x8x256xbf16> to vector<8x256xbf16>
    %cst_7 = arith.constant dense<0.000000e+00> : vector<128x256xf32>
    %7 = tpu.matmul %4, %6, %cst_7 {dimension_numbers = #tpu.dot_dimension_numbers<[0], [0], [1], [1], [0, 1, 1, 1], [], []>} : vector<8x128xbf16>, vector<8x256xbf16>, vector<128x256xf32> -> vector<128x256xf32>
    %c0_8 = arith.constant 0 : index
    %c0_9 = arith.constant 0 : index
    %c0_10 = arith.constant 0 : index
    %8 = vector.load %arg4[%c0_8, %c0_9, %c0_10] : memref<1x1x256xf32, #tpu.memory_space<vmem>>, vector<1x1x256xf32>
    %9 = vector.shape_cast %8 : vector<1x1x256xf32> to vector<1x256xf32>
    %10 = vector.broadcast %9 : vector<1x256xf32> to vector<128x256xf32>
    %11 = arith.addf %7, %10 : vector<128x256xf32>
    %cst_11 = arith.constant dense<0xFF800000> : vector<128xf32>
    %12 = vector.multi_reduction <maximumf>, %11, %cst_11 [1] : vector<128x256xf32> to vector<128xf32>
    %13 = vector.shape_cast %12 : vector<128xf32> to vector<128x1xf32>
    %14 = vector.broadcast %13 : vector<128x1xf32> to vector<128x256xf32>
    %15 = arith.subf %11, %14 : vector<128x256xf32>
    %16 = arith.truncf %15 : vector<128x256xf32> to vector<128x256xbf16>
    %17 = math.exp %16 : vector<128x256xbf16>
    %c0_12 = arith.constant 0 : index
    %c0_13 = arith.constant 0 : index
    %c0_14 = arith.constant 0 : index
    %18 = vector.load %arg5[%c0_12, %c0_13, %c0_14] : memref<1x32x256xbf16, #tpu.memory_space<vmem>>, vector<1x32x256xbf16>
    %19 = vector.shape_cast %18 : vector<1x32x256xbf16> to vector<32x256xbf16>
    %cst_15 = arith.constant dense<0.000000e+00> : vector<32x128xf32>
    %20 = tpu.matmul %19, %17, %cst_15 {dimension_numbers = #tpu.dot_dimension_numbers<[1], [1], [0], [0], [0, 0, 1, 0], [], []>} : vector<32x256xbf16>, vector<128x256xbf16>, vector<32x128xf32> -> vector<32x128xf32>
    %c0_16 = arith.constant 0 : index
    %21 = memref.load %arg7[%c0_16] : memref<1xf32, #tpu.memory_space<smem>>
    %22 = vector.extract_strided_slice %20 {offsets = [16, 0], sizes = [1, 128], strides = [1, 1]} : vector<32x128xf32> to vector<1x128xf32>
    %23 = tpu.reciprocal %22 {approx = true} : vector<1x128xf32> -> vector<1x128xf32>
    %24 = vector.broadcast %21 : f32 to vector<1x128xf32>
    %25 = arith.mulf %24, %23 : vector<1x128xf32>
    %26 = vector.extract_strided_slice %20 {offsets = [0, 0], sizes = [16, 128], strides = [1, 1]} : vector<32x128xf32> to vector<16x128xf32>
    %27 = vector.broadcast %25 : vector<1x128xf32> to vector<16x128xf32>
    %28 = arith.mulf %26, %27 : vector<16x128xf32>
    %29 = arith.addf %28, %1 : vector<16x128xf32>
    %c0_17 = arith.constant 0 : index
    %c0_18 = arith.constant 0 : index
    %c0_19 = arith.constant 0 : index
    %30 = vector.load %arg8[%c0_17, %c0_18, %c0_19] : memref<1x16x128xf32, #tpu.memory_space<vmem>>, vector<1x16x128xf32>
    %31 = vector.shape_cast %30 : vector<1x16x128xf32> to vector<16x128xf32>
    %32 = vector.shape_cast %29 : vector<16x128xf32> to vector<1x16x128xf32>
    tpu.vector_store %arg8[%c0_17, %c0_18, %c0_19], %32 {strides = array<i32>} : memref<1x16x128xf32, #tpu.memory_space<vmem>>, vector<1x16x128xf32>,
    return
  }
  func.func @transform_0(%arg0: i32, %arg1: i32) -> (i32, i32, i32) {
    %c0_i32 = arith.constant 0 : i32
    %c0_i32_0 = arith.constant 0 : i32
    return %arg0, %c0_i32, %arg1 : i32, i32, i32
  }
  func.func @transform_1(%arg0: i32, %arg1: i32) -> (i32, i32, i32) {
    %c0_i32 = arith.constant 0 : i32
    %c0_i32_0 = arith.constant 0 : i32
    %c0_i32_1 = arith.constant 0 : i32
    return %arg0, %c0_i32, %c0_i32_0 : i32, i32, i32
  }
  func.func @transform_2(%arg0: i32, %arg1: i32) -> (i32, i32, i32) {
    %c0_i32 = arith.constant 0 : i32
    %c0_i32_0 = arith.constant 0 : i32
    %c0_i32_1 = arith.constant 0 : i32
    return %arg0, %c0_i32, %c0_i32_0 : i32, i32, i32
  }
  func.func @transform_3(%arg0: i32, %arg1: i32) -> (i32, i32, i32) {
    %c0_i32 = arith.constant 0 : i32
    %c0_i32_0 = arith.constant 0 : i32
    %c0_i32_1 = arith.constant 0 : i32
    return %arg0, %c0_i32, %c0_i32_0 : i32, i32, i32
  }
  func.func @transform_4(%arg0: i32, %arg1: i32) -> (i32, i32) {
    %c0_i32 = arith.constant 0 : i32
    %c0_i32_0 = arith.constant 0 : i32
    %c0_i32_1 = arith.constant 0 : i32
    return %c0_i32, %c0_i32_0 : i32, i32
  }
  func.func @transform_5(%arg0: i32, %arg1: i32) -> i32 {
    %c0_i32 = arith.constant 0 : i32
    %c0_i32_0 = arith.constant 0 : i32
    return %c0_i32 : i32
  }
  func.func @transform_6(%arg0: i32, %arg1: i32) -> (i32, i32, i32) {
    %c0_i32 = arith.constant 0 : i32
    %c0_i32_0 = arith.constant 0 : i32
    return %arg0, %c0_i32, %arg1 : i32, i32, i32
  }
}

</mosaic_0001>

<bundles_post_ra>
// kernel: tpu_custom_call.1
= control target key start
LH: loop header
LB: loop body
LE: loop exit
PB: predicated region body
PF: predicated region fallthrough
CT: control target
= control target key end

     0   :  { %s2096_s0 = inlined_call_operand.hbm [shape: f32[2,16,256], index: 0, kind: input, shape index: {}]   ;;  %s2097_s1 = inlined_call_operand.hbm [shape: bf16[2,8,256], index: 1, kind: input, shape index: {}]   ;;  %s2098_s2 = inlined_call_operand.vmem [shape: f32[2,1,256], index: 2, kind: input, shape index: {}]   ;;  %s2099_s3 = inlined_call_operand.hbm [shape: bf16[2,32,256], index: 3, kind: input, shape index: {}]   ;;  %s2100_s4 = inlined_call_operand.vmem [shape: f32[8,16], index: 4, kind: input, shape index: {}]   ;;  %s2101_s5 = inlined_call_operand.<no memory space> [shape: f32[1], index: 5, kind: input, shape index: {}]   ;;  %s2102_s6 = inlined_call_operand.hbm [shape: f32[2,16,256], index: 6, kind: output, shape index: {}]  }
   0x1   :  { %2117 = sst [smem:[#allocation22_spill]] %s2097_s1 }
   0x2   :  { %2118 = sst [smem:[#allocation23_spill]] %s2102_s6 }
   0x3   :  { %11 = sst [smem:[#allocation2]] %s2101_s5 }
   0x4   :  { %12 = vsyncpa [#allocation4], 0 }
   0x5   :  { %14 = vsyncpa [#allocation4 + $0x1], 0 }
   0x6   :  { %15 = vsyncpa [#allocation7], 0 }
   0x7   :  { %17 = vsyncpa [#allocation7 + $0x1], 0 }
   0x8   :  { %18 = vsyncpa [#allocation5], 0 }
   0x9   :  { %20 = vsyncpa [#allocation5 + $0x1], 0  ;;  %s1531_s23 = smov 0   ;;  %s1533_s24 = smov 0  }
   0xa   :  { %s1535_s25 = smov 0   ;;  %s1537_s26 = smov 0  }
   0xb   :  { %s1539_s27 = smov 0   ;;  %s1541_s28 = smov 0  }
   0xc   :  { %s1543_s29 = smov 0   ;;  %s1545_s5 = smov 0  }
   0xd   :  { %s1547_s30 = smov 0   ;;  %s1549_s7 = smov 0  }
   0xe   :  { %s1551_s8 = smov 0  }
   0xf LB: > { %2119 = sst [smem:[#allocation13_spill]] %s1445_s25  ;;  %s1587_s9 = sadd.s32 4294967295, %s1477_s8   ;;  %s1477_s8 = sphi %s1551_s8, %s26_s8   ;;  %s1473_s7 = sphi %s1549_s7, %s2164_s7   ;;  %s1469_s30 = sphi %s1547_s30, %s2163_s30   ;;  %s1465_s5 = sphi %s1545_s5, %s2162_s5   ;;  %s1461_s29 = sphi %s1543_s29, %s2161_s29   ;;  %s1457_s28 = sphi %s1541_s28, %s2154_s28   ;;  %s1453_s27 = sphi %s1539_s27, %s2160_s27   ;;  %s1449_s26 = sphi %s1537_s26, %s2159_s26   ;;  %s1445_s25 = sphi %s1535_s25, %s2152_s25   ;;  %s1441_s24 = sphi %s1533_s24, %s2158_s24   ;;  %s1437_s23 = sphi %s1531_s23, %s2157_s23  }
  0x10   : > { %2120 = sst [smem:[#allocation14_spill]] %s1449_s26  ;;  %s1027_s10 = sadd.s32 4294967294, %s1477_s8  }
  0x11   : > { %2121 = sst [smem:[#allocation15_spill]] %s1457_s28  ;;  %s35_s11 = sadd.s32 1, %s1469_s30 }
  0x12   : > { %s38_s12 = sadd.s32 1, %s1473_s7  ;;  %p36_p0 = scmp.ge.s32.totalorder %s35_s11, 2 }
  0x13   : > { %s47_s13 = sadd.s32 1, %s1457_s28  ;;  %p54_p1 = scmp.ne.s32.totalorder %s1457_s28, %s1453_s27 }
  0x14   : > { %p55_p2 = scmp.eq.s32.totalorder %s1477_s8, 0  ;;  %s2166_s11 = smov (%p36_p0, %s35_s11), 0 }
  0x15   : > { %2122 = sst [smem:[#allocation16_spill]] %s2166_s11  ;;  %s2168_s12 = smov (!%p36_p0, %s38_s12), %s1473_s7 }
  0x16   : > { %s43_s14 = ssub.s32 %s1469_s30, %s2166_s11  ;;  %p1606_p3 = por %p55_p2, %p54_p1 }
  0x17   : > { %p40_p4 = scmp.ge.s32.totalorder %s2168_s12, 2  ;;  %p2104_p5 = scmp.ne.s32.totalorder %s1453_s27, %s1449_s26 }
  0x18   : > { %p61_p6 = scmp.eq.s32.totalorder %s1587_s9, 0  ;;  %s73_s16 = sadd.s32 1, %s1445_s25 }
  0x19   : > { %s2170_s12 = smov (%p40_p4, %s2168_s12), 0  ;;  %p80_p8 = scmp.ne.s32.totalorder %s1445_s25, %s1441_s24 }
  0x1a   : > { %2124 = sst [smem:[#allocation17_spill]] %s2170_s12  ;;  %p1621_p7 = por %p61_p6, %p2104_p5 }
  0x1b   : > { %s42_s18 = ssub.s32 %s1473_s7, %s2170_s12  ;;  %p86_p9 = scmp.ne.s32.totalorder %s1441_s24, %s1437_s23 }
  0x1c   : > { %s2125_s17 = scalar_select %p1621_p7, 1, 0 }
  0x1d   : > { %s44_s19 = sor.u32 %s43_s14, %s42_s18  ;;  %p71_p10 = scmp.eq.s32.totalorder %s42_s18, 0 }
  0x1e   : > { %p45_p11 = scmp.eq.s32.totalorder %s44_s19, 0  ;;  %p1633_p12 = por %p80_p8, %p55_p2 }
  0x1f   : > { %s1638_s21 = scalar_select %p71_p10, %s1445_s25, %s73_s16  }
  0x20   : > { %s1641_s22 = scalar_select %p45_p11, %s1457_s28, %s47_s13  }
  0x21   : > { %2127 = sst [smem:[#allocation18_spill]] %s1638_s21  ;;  %p1645_p13 = por %p86_p9, %p61_p6 }
  0x22   : > { %2128 = sst [smem:[#allocation19_spill]] %s1641_s22  ;;  %p206_p0 = scmp.eq.s32.totalorder %s1587_s9, 3 }
  0x23   : > { %s2129_s11 = scalar_select %p1645_p13, 1, 0 }
  0x24   : > { %p212_p4 = scmp.eq.s32.totalorder %s1027_s10, 3  ;;  %p1653_p5 = por %p206_p0, %p54_p1 }
  0x25   : > { %p1119_p2 = scmp.lt.s32.totalorder %s1477_s8, 4  ;;  %p2132_p8 = scmp.ne.s32.totalorder %s1453_s27, %s1449_s26 }
  0x26   : > { %s2130_s23 = scalar_select %p1653_p5, 1, 0 }
  0x27   : > { %p1661_p7 = por %p212_p4, %p2132_p8  ;;  %s260_s13 = sand.u32 1, %s1477_s8  }
  0x28   : > { %2131 = sst [smem:[#allocation20_spill]] %s2130_s23  ;;  %p1668_p10 = pnand %p1119_p2, %p1606_p3 }
  0x29   : > { %s2133_s14 = scalar_select %p1661_p7, 1, 0 }
  0x2a   : > { %s262_s18 = sand.u32 1, %s1445_s25   ;;  %s1066_s19 = sshll.u32 %s1473_s7, 7 }
  0x2b   : > { %2134 = sst [smem:[#allocation21_spill]] %s2133_s14  ;;  %s1033_s10 = sshll.u32 %s262_s18, 3 }
  0x2c   : > { %s2136_s1 = sld [smem:[#allocation22_spill]]  ;;  %s264_s26 = scalar_lea.vmem [#allocation6], %s1033_s10 }
  0x2d   : > { %s272_s14 = sshll.u32 %s264_s26, 4  ;;  %p1681_p1 = pnand %p1119_p2, %p1633_p12  ;;  %s1685_s14 = int_to_ptr.vmem [resolvable:$true] %s272_s14 }
  0x2e   : > { %s1687_s25 = sshll.u32 %s262_s18, 5  ;;  %s1689_s12 = scalar_lea.sflag [#allocation7], %s260_s13 }
  0x2f   : > { %p2116_p6 = pneg %p1681_p1 }
  0x32   : > { %s1677_s21 = scalar_lea.hbm %s2136_s1, %s1066_s19  ;;  %s1266_s19 = scalar_lea.hbm %s2136_s1, 256 }
  0x33   : > { %s1261_s22 = scalar_lea.hbm %s1677_s21, 128  ;;  %p1267_p12 = scmp.lt.u32.totalorder %s1677_s21, %s2136_s1 }
  0x34   : > { %p1262_p3 = scmp.ne.s32.totalorder %s1677_s21, %s1261_s22  ;;  %p1268_p0 = scmp.lt.u32.totalorder %s1266_s19, %s1261_s22 }
  0x35   : > { %p1270_p2 = scmp.lt.u32.totalorder %s1261_s22, %s1677_s21 }
  0x36   : > { %p1264_p9 = pnand %p2116_p6, %p1262_p3  ;;  %p1269_p4 = por %p1268_p0, %p1267_p12 }
  0x38   : > { %p1265_p11 = pneg %p1264_p9  ;;  %p1271_p8 = por %p1270_p2, %p1269_p4 }
  0x3a   : > { %p1272_p7 = pnand %p1271_p8, %p1265_p11 }
  0x3c   : > { %1275 = shalt.err (!%p1272_p7)
}
  0x3d   : > { %s1276_s13 = scalar_lea.vmem %s1685_s14, 128  ;;  %s1479_s18 = smov [#allocation6]  }
  0x3e   : > { %p1277_p3 = scmp.ne.s32.totalorder %s1685_s14, %s1276_s13  ;;  %s1281_s26 = sshll.u32 %s1479_s18, 4  ;;  %s1282_s26 = int_to_ptr.vmem [resolvable:$false] %s1281_s26 }
  0x3f   : > { %s1283_s6 = scalar_lea.vmem %s1282_s26, 256  ;;  %p1284_p13 = scmp.lt.s32.totalorder %s1685_s14, %s1282_s26 }
  0x40   : > { %p1279_p9 = pnand %p1277_p3, %p2116_p6  ;;  %p1285_p12 = scmp.lt.s32.totalorder %s1283_s6, %s1276_s13 }
  0x42   : > { %p1280_p5 = pneg %p1279_p9  ;;  %p1286_p0 = por %p1285_p12, %p1284_p13 }
  0x44   : > { %p1287_p4 = pnand %p1286_p0, %p1280_p5 }
  0x46   : > { %1290 = shalt.err (!%p1287_p4)
}
  0x47   : > { %1111 = dma.hbm_to_vmem [thread:$0]  (!%p1681_p1), %s1677_s21, 128, %s1685_s14, %s1689_s12  }
  0x48   : > { %s290_s22 = scalar_lea.vmem [#allocation8], %s1687_s25  ;;  %p1039_p7 = scmp.ge.s32.totalorder %s1477_s8, 1 }
  0x49   : > { %s297_s20 = sshll.u32 %s290_s22, 4  ;;  %p305_p5 = scmp.lt.s32.totalorder %s1477_s8, 5  ;;  %s1719_s20 = int_to_ptr.vmem [resolvable:$true] %s297_s20 }
  0x4a   : > { %s238_s10 = sand.u32 1, %s1457_s28   ;;  %s1031_s18 = sshll.u32 %s1473_s7, 2 }
  0x4b   : > { %p1722_p13 = pnand %p1039_p7, %p305_p5  ;;  %s1030_s13 = sshll.u32 %s238_s10, 4 }
  0x4c   : > { %s247_s26 = sadd.s32 %s1469_s30, %s1031_s18  ;;  %s242_s6 = scalar_lea.vmem [#allocation3], %s1030_s13 }
  0x4d   : > { %s2138_s19 = scalar_select %p1722_p13, 1, 0 }
  0x4e   : > { %s250_s1 = sshll.u32 %s242_s6, 4  ;;  %s1032_s23 = sshll.u32 %s247_s26, 7  ;;  %s1729_s1 = int_to_ptr.vmem [resolvable:$true] %s250_s1 }
  0x4f   : > { %s1734_s14 = scalar_lea.hbm %s2096_s0, %s1032_s23  ;;  %s1736_s22 = scalar_lea.sflag [#allocation4], %s238_s10 }
  0x50   : > { %s1291_s28 = scalar_lea.hbm %s1734_s14, 256  ;;  %p1293_p2 = pneg %p1668_p10 }
  0x51   : > { %p1292_p11 = scmp.ne.s32.totalorder %s1734_s14, %s1291_s28  ;;  %s1296_s26 = scalar_lea.hbm %s2096_s0, 1024 }
  0x52   : > { %p1297_p9 = scmp.lt.u32.totalorder %s1734_s14, %s2096_s0  ;;  %p1298_p12 = scmp.lt.u32.totalorder %s1296_s26, %s1291_s28 }
  0x53   : > { %p1294_p8 = pnand %p1293_p2, %p1292_p11  ;;  %p1300_p4 = scmp.lt.u32.totalorder %s1291_s28, %s1734_s14 }
  0x54   : > { %p1299_p0 = por %p1298_p12, %p1297_p9 }
  0x55   : > { %p1295_p3 = pneg %p1294_p8 }
  0x56   : > { %p1301_p7 = por %p1300_p4, %p1299_p0 }
  0x58   : > { %p1302_p5 = pnand %p1301_p7, %p1295_p3 }
  0x5a   : > { %1305 = shalt.err (!%p1302_p5)
}
  0x5b   : > { %s1306_s10 = scalar_lea.vmem %s1729_s1, 256  ;;  %s1480_s25 = smov [#allocation3]  }
  0x5c   : > { %p1307_p11 = scmp.ne.s32.totalorder %s1729_s1, %s1306_s10  ;;  %s1311_s21 = sshll.u32 %s1480_s25, 4  ;;  %s1312_s21 = int_to_ptr.vmem [resolvable:$false] %s1311_s21 }
  0x5d   : > { %s1313_s13 = scalar_lea.vmem %s1312_s21, 512  ;;  %p1314_p13 = scmp.lt.s32.totalorder %s1729_s1, %s1312_s21 }
  0x5e   : > { %p1309_p8 = pnand %p1307_p11, %p1293_p2  ;;  %p1315_p9 = scmp.lt.s32.totalorder %s1313_s13, %s1306_s10 }
  0x60   : > { %p1310_p6 = pneg %p1309_p8  ;;  %p1316_p12 = por %p1315_p9, %p1314_p13 }
  0x62   : > { %p1317_p0 = pnand %p1316_p12, %p1310_p6 }
  0x64   : > { %1320 = shalt.err (!%p1317_p0)
}
  0x65   : > { %s1481_s28 = smov 256   ;;  %s1482_s18 = smov 128  }
  0x66   : > { %s1483_s26 = smov 8   ;;  %s1067_s23 = sshll.u32 %s1473_s7, 9 }
  0x67   : > { %1108 = dma.hbm_to_vmem [thread:$0]  (!%p1668_p10), %s1734_s14, 256, %s1729_s1, %s1736_s22, %s1481_s28, %s1482_s18, %s1483_s26  }
  0x68   : > { %s1770_s10 = scalar_lea.hbm %s2099_s3, %s1067_s23  ;;  %p2139_p13 = pneg %p1681_p1 }
  0x69   : > { %s1321_s21 = scalar_lea.hbm %s1770_s10, 512  ;;  %s1326_s1 = scalar_lea.hbm %s2099_s3, 1024 }
  0x6a   : > { %p1322_p6 = scmp.ne.s32.totalorder %s1770_s10, %s1321_s21  ;;  %p1327_p10 = scmp.lt.u32.totalorder %s1770_s10, %s2099_s3 }
  0x6b   : > { %p1328_p4 = scmp.lt.u32.totalorder %s1326_s1, %s1321_s21  ;;  %p1330_p5 = scmp.lt.u32.totalorder %s1321_s21, %s1770_s10 }
  0x6c   : > { %p1324_p2 = pnand %p1322_p6, %p2139_p13 }
  0x6d   : > { %p1329_p7 = por %p1328_p4, %p1327_p10 }
  0x6e   : > { %p1325_p3 = pneg %p1324_p2 }
  0x6f   : > { %p1331_p11 = por %p1330_p5, %p1329_p7 }
  0x71   : > { %p1332_p8 = pnand %p1331_p11, %p1325_p3 }
  0x73   : > { %1335 = shalt.err (!%p1332_p8)
}
  0x74   : > { %s1336_s28 = scalar_lea.vmem %s1719_s20, 512  ;;  %p2140_p12 = pmov %p2139_p13 }
  0x75   : > { %p1337_p9 = scmp.ne.s32.totalorder %s1719_s20, %s1336_s28  ;;  %s1484_s23 = smov [#allocation8]  }
  0x76   : > { %s1341_s6 = sshll.u32 %s1484_s23, 4  ;;  %s1342_s6 = int_to_ptr.vmem [resolvable:$false] %s1341_s6 }
  0x77   : > { %p1339_p0 = pnand %p1337_p9, %p2140_p12  ;;  %s1343_s25 = scalar_lea.vmem %s1342_s6, 1024 }
  0x78   : > { %p1344_p13 = scmp.lt.s32.totalorder %s1719_s20, %s1342_s6  ;;  %p1345_p2 = scmp.lt.s32.totalorder %s1343_s25, %s1336_s28 }
  0x79   : > { %p1340_p6 = pneg %p1339_p0 }
  0x7a   : > { %p1346_p10 = por %p1345_p2, %p1344_p13 }
  0x7c   : > { %p1347_p4 = pnand %p1346_p10, %p1340_p6 }
  0x7e   : > { %1350 = shalt.err (!%p1347_p4)
}
  0x7f   : > { %1114 = dma.hbm_to_vmem [thread:$0]  (!%p1681_p1), %s1770_s10, 512, %s1719_s20, %s1689_s12, %s1482_s18, %s1482_s18, %s1483_s26  }
  0x80   : > { %p2141_p3 = scmp.ne.s32.totalorder %s2138_s19, 0 }
  0x81   : > { %s1802_s21 = sand.u32 (!%p2141_p3), 1, %s1453_s27   ;;  %p2142_p7 = scmp.ne.s32.totalorder (!%p2141_p3), %s2125_s17, 0 }
  0x82   : > { %309 = sbr.rel (%p2141_p3) target bundleno = 1159 (0x487), region = 44  ;;  %s1040_s16 = sshll.u32 (!%p2141_p3), %s1802_s21, 4 }
  0x83   : > { %s312_s13 = scalar_lea.sflag (!%p2141_p3), [#allocation4], %s1802_s21  ;;  %s315_s15 = scalar_lea.vmem (!%p2141_p3), [#allocation3], %s1040_s16 }
  0x89   : > { %1424 = dma.done.wait (%p2142_p7), %s312_s13, 256  }
  0x8a   : > { %1426 = vsyncadd (%p2142_p7), %s312_s13, 4294967040  ;;  %s320_s12 = sand.u32 1, %s1587_s9   ;;  %s322_s20 = sand.u32 1, %s1441_s24  }
  0x8b   : > { %s1041_s19 = sshll.u32 %s322_s20, 3  ;;  %s321_s18 = scalar_lea.sflag [#allocation7], %s320_s12 }
  0x8c   : > { %s324_s26 = scalar_lea.vmem [#allocation6], %s1041_s19  ;;  %p2143_p1 = scmp.ne.s32.totalorder %s2129_s11, 0 }
  0x8e   : > { %1428 = dma.done.wait (%p2143_p1), %s321_s18, 640  }
  0x8f   : > { %1430 = vsyncadd (%p2143_p1), %s321_s18, 4294966656  ;;  %v1485_v0 = vmov 0.0|0.0   ;;  %vm1486_vm0 = vmmov 0   ;;  %v1487_v1 = vmov 0.0   ;;  %v1820_v2 = vld [vmem:[%s315_s15] sm:$0xff]  ;;  %v1822_v3 = vld [vmem:[%s315_s15 + $0x8] sm:$0xff]  ;;  %v462_v22 = vlaneseq }
  0x90   : > { %1078 = vmatprep.subr.bf16.mxu0 %v1485_v0  ;;  %1075 = vmatprep.mubr.msk.f32.mxu0 %vm1486_vm0, %v1487_v1  ;;  %v1079_v4 = vpack.c.bf16 %v1822_v3, %v1820_v2  ;;  %v383_v5 = vld [vmem:[%s2100_s4] sm:$0xff]  ;;  %vm384_vm1 = vcmask 130048   ;;  %vm518_vm2 = vcmask 1043456   ;;  %v1488_v9 = vmov 0   ;;  %p376_p5 = scmp.lt.s32.totalorder %s1465_s5, 1  ;;  %s1042_s28 = sshll.u32 %s322_s20, 5 }
  0x91   : > { %v459_v6 = vld [vmem:[%s324_s26] sm:$0xff]  ;;  %557 = vmatprep.mubr.bf16.mxu1 %v1488_v9  ;;  %vm493_vm3 = vcmask 64512   ;;  %v1839_v23 = vshrl.u32 %v462_v22, 7  ;;  %s1982_s23 = scalar_lea.vmem [#allocation8], %s1042_s28  ;;  %s854_s6 = sld [smem:[#allocation2]] }
  0x92   : > { %1080 = vmatpush3.bf16.msra.mxu0 %v1079_v4  ;;  %v1047_v7 = vcombine.high %v459_v6, %v459_v6  ;;  %v1046_v8 = vcombine.low %v459_v6, %v459_v6  ;;  %s377_s11 = scalar_select %p376_p5, %s1465_s5, 1 }
  0x93   : > { %v464_v24 = vsub.s32 0, %v1839_v23  ;;  %v468_v26 = vsub.s32 1, %v1839_v23  ;;  %s1062_s25 = sshll.u32 %s1465_s5, 2  ;;  %s2144_s15 = sld [smem:[#allocation20_spill]] }
  0x94   : > { %1048 = vmatprep.subr.msk.bf16.mxu1 %vm518_vm2, %v1047_v7  ;;  %v520_v10 = vsel %vm518_vm2, %v1046_v8, 0  ;;  %s1044_s10 = sshll.u32 %s377_s11, 1  ;;  %s880_s13 = sadd.s32 %s1461_s29, %s1062_s25 }
  0x95   : > { %1076 = vmatmul.mubr.msk.f32.vlgmr.msra.gmra.mrb[0].mxu0 %vm384_vm1, %v383_v5  ;;  %526 = vmatpush1.bf16.msra.mxu1 %v520_v10  ;;  %s379_s22 = scalar_lea.vmem %s2098_s2, %s1044_s10  ;;  %s375_s12 = scalar_lea.vmem [#allocation9], %s1040_s16 }
  0x96   : > { %v460_v25 = vld [vmem:[%s379_s22] sm:$0x3]  ;;  %s883_s20 = sshll.u32 %s375_s12, 4  ;;  %s1063_s19 = sshll.u32 %s880_s13, 7  ;;  %s2026_s20 = int_to_ptr.vmem [resolvable:$true] %s883_s20 }
  0x97   : > { %v1848_v27 = vrot.slane %v460_v25, %v464_v24  ;;  %v1850_v28 = vrot.slane %v460_v25, %v468_v26  ;;  %s2145_s26 = sld [smem:[#allocation23_spill]]  ;;  %s869_s16 = scalar_lea.sflag [#allocation5], %s1802_s21 }
  0x98   : > { %s1351_s17 = scalar_lea.vmem %s2026_s20, 256  ;;  %s1489_s11 = smov [#allocation9]  }
  0x99   : > { %p1352_p11 = scmp.ne.s32.totalorder %s2026_s20, %s1351_s17  ;;  %p2147_p8 = scmp.ne.s32.totalorder %s2144_s15, 0 }
  0x9a   : > { %s1355_s10 = sshll.u32 %s1489_s11, 4  ;;  %s1356_s10 = int_to_ptr.vmem [resolvable:$false] %s1355_s10 }
  0x9b   : > { %p1353_p9 = pnand %p1352_p11, %p2147_p8  ;;  %s1357_s1 = scalar_lea.vmem %s1356_s10, 512 }
  0x9c   : > { %p1358_p0 = scmp.lt.s32.totalorder %s2026_s20, %s1356_s10  ;;  %p1359_p6 = scmp.lt.s32.totalorder %s1357_s1, %s1351_s17 }
  0x9d   : > { %s2146_s9 = smov %s2145_s26  ;;  %s2031_s29 = scalar_lea.hbm %s2145_s26, %s1063_s19 }
  0x9e   : > { %p1354_p12 = pneg %p1353_p9  ;;  %p1360_p13 = por %p1359_p6, %p1358_p0 }
  0xa0   : > { %p1361_p2 = pnand %p1360_p13, %p1354_p12 }
 0x168   : > { %v454_v11 = vpop.f32.mrb[0].mxu0 }
 0x169   : > { %v1077_v12 = vpop.f32.mrb[1].mxu0  ;;  %v458_v13 = vpack.c.bf16 %v454_v11, %v454_v11 }
 0x16b   : > { %472 = vxpose.xlu0.c.b16.start.end [1/1] (short) %v458_v13, 128 }
 0x1d1   : > { %v480_v14 = vpop.trf.xlu0 }
 0x1d2   : > { %1049 = vmatmul.mubr.msk.bf16.vlgmr.msra.gmra.mrb[0].mxu1 %vm493_vm3, %v480_v14 }
 0x1d3   : > { %567 = vmatprep.mubr.bf16.mxu1 %v1488_v9 }
 0x1d5   : > { %v481_v15 = vpop.trf.xlu0 }
 0x1d9   : > { %v482_v16 = vpop.trf.xlu0 }
 0x1da   : > { %1050 = vmatmul.mubr.msk.bf16.gmra.mrb[4].mxu1 %vm493_vm3, %v481_v15 }
 0x1db   : > { %577 = vmatprep.mubr.bf16.mxu1 %v1488_v9 }
 0x1dd   : > { %v483_v17 = vpop.trf.xlu0 }
 0x1e1   : > { %v484_v18 = vpop.trf.xlu0 }
 0x1e2   : > { %1051 = vmatmul.mubr.msk.bf16.gmra.mrb[8].mxu1 %vm493_vm3, %v482_v16 }
 0x1e3   : > { %587 = vmatprep.mubr.bf16.mxu1 %v1488_v9 }
 0x1e5   : > { %v485_v19 = vpop.trf.xlu0 }
 0x1e9   : > { %v486_v20 = vpop.trf.xlu0 }
 0x1ea   : > { %1052 = vmatmul.mubr.msk.bf16.gmra.mrb[12].mxu1 %vm493_vm3, %v483_v17 }
 0x1eb   : > { %597 = vmatprep.mubr.bf16.mxu1 %v1488_v9 }
 0x1ed   : > { %v487_v21 = vpop.trf.xlu0 }
 0x1f2   : > { %1053 = vmatmul.mubr.msk.bf16.gmra.mrb[16].mxu1 %vm493_vm3, %v484_v18 }
 0x1f3   : > { %607 = vmatprep.mubr.bf16.mxu1 %v1488_v9 }
 0x1fa   : > { %1054 = vmatmul.mubr.msk.bf16.gmra.mrb[20].mxu1 %vm493_vm3, %v485_v19 }
 0x1fb   : > { %617 = vmatprep.mubr.bf16.mxu1 %v1488_v9 }
 0x202   : > { %1055 = vmatmul.mubr.msk.bf16.gmra.mrb[24].mxu1 %vm493_vm3, %v486_v20 }
 0x203   : > { %627 = vmatprep.mubr.bf16.mxu1 %v1488_v9 }
 0x20a   : > { %1056 = vmatmul.mubr.msk.bf16.gmra.mrb[28].mxu1 %vm493_vm3, %v487_v21 }
 0x2a5   : > { %v559_v29 = vpop.f32.mrb[0].mxu1 }
 0x2a6   : > { %v1853_v30 = vadd.f32 %v559_v29, %v1848_v27  ;;  %v561_v31 = vpop.f32.mrb[1].mxu1 }
 0x2a7   : > { %v1856_v32 = vadd.f32 %v561_v31, %v1850_v28  ;;  %v563_v33 = vpop.f32.mrb[2].mxu1 }
 0x2a8   : > { %v1859_v34 = vadd.f32 %v563_v33, %v1848_v27  ;;  %v565_v35 = vpop.f32.mrb[3].mxu1 }
 0x2a9   : > { %v1862_v36 = vadd.f32 %v565_v35, %v1850_v28  ;;  %v638_v37 = vmax.f32 %v1853_v30, %v1856_v32 }
 0x2ab   : > { %639 = vmax.xlane.f32.xlu0 %v638_v37  ;;  %v641_v38 = vmax.f32 %v1859_v34, %v1862_v36 }
 0x2ad   : > { %642 = vmax.xlane.f32.xlu1 %v641_v38  ;;  %v569_v39 = vpop.f32.mrb[4].mxu1 }
 0x2ae   : > { %v1869_v40 = vadd.f32 %v569_v39, %v1848_v27  ;;  %v571_v41 = vpop.f32.mrb[5].mxu1 }
 0x2af   : > { %v1872_v42 = vadd.f32 %v571_v41, %v1850_v28  ;;  %v573_v43 = vpop.f32.mrb[6].mxu1 }
 0x2b0   : > { %v575_v44 = vpop.f32.mrb[7].mxu1  ;;  %v1875_v45 = vadd.f32 %v573_v43, %v1848_v27 }
 0x2b1   : > { %v1878_v46 = vadd.f32 %v575_v44, %v1850_v28  ;;  %v644_v47 = vmax.f32 %v1869_v40, %v1872_v42 }
 0x2b3   : > { %645 = vmax.xlane.f32.xlu1 %v644_v47  ;;  %v647_v49 = vmax.f32 %v1875_v45, %v1878_v46 }
 0x2b5   : > { %v579_v48 = vpop.f32.mrb[8].mxu1 }
 0x2b6   : > { %v1885_v50 = vadd.f32 %v579_v48, %v1848_v27  ;;  %v581_v51 = vpop.f32.mrb[9].mxu1 }
 0x2b7   : > { %v1888_v52 = vadd.f32 %v581_v51, %v1850_v28  ;;  %648 = vmax.xlane.f32.xlu1 %v647_v49  ;;  %v583_v53 = vpop.f32.mrb[10].mxu1 }
 0x2b8   : > { %v585_v54 = vpop.f32.mrb[11].mxu1  ;;  %v1891_v55 = vadd.f32 %v583_v53, %v1848_v27 }
 0x2b9   : > { %v1894_v56 = vadd.f32 %v585_v54, %v1850_v28  ;;  %v650_v57 = vmax.f32 %v1885_v50, %v1888_v52 }
 0x2bb   : > { %651 = vmax.xlane.f32.xlu1 %v650_v57  ;;  %v653_v59 = vmax.f32 %v1891_v55, %v1894_v56 }
 0x2bd   : > { %v589_v58 = vpop.f32.mrb[12].mxu1 }
 0x2be   : > { %v1901_v60 = vadd.f32 %v589_v58, %v1848_v27  ;;  %v591_v61 = vpop.f32.mrb[13].mxu1 }
 0x2bf   : > { %v1904_v62 = vadd.f32 %v591_v61, %v1850_v28  ;;  %654 = vmax.xlane.f32.xlu1 %v653_v59  ;;  %v593_v63 = vpop.f32.mrb[14].mxu1 }
 0x2c0   : > { %v595_v0 = vpop.f32.mrb[15].mxu1  ;;  %v1907_v1 = vadd.f32 %v593_v63, %v1848_v27 }
 0x2c1   : > { %v1910_v4 = vadd.f32 %v595_v0, %v1850_v28  ;;  %v656_v5 = vmax.f32 %v1901_v60, %v1904_v62 }
 0x2c3   : > { %657 = vmax.xlane.f32.xlu1 %v656_v5  ;;  %v659_v7 = vmax.f32 %v1907_v1, %v1910_v4  ;;  %v1226_v5 = vld [vmem:[%s1982_s23 + $0x4] ss:$8 sps:$4 sm:$0xff]  }
 0x2c4   : > { %838 = vmatprep.mubr.bf16.mxu0 %v1226_v5 }
 0x2c5   : > { %v599_v6 = vpop.f32.mrb[16].mxu1 }
 0x2c6   : > { %v1917_v8 = vadd.f32 %v599_v6, %v1848_v27  ;;  %v601_v9 = vpop.f32.mrb[17].mxu1 }
 0x2c7   : > { %v1920_v10 = vadd.f32 %v601_v9, %v1850_v28  ;;  %660 = vmax.xlane.f32.xlu1 %v659_v7  ;;  %v603_v11 = vpop.f32.mrb[18].mxu1 }
 0x2c8   : > { %v605_v12 = vpop.f32.mrb[19].mxu1  ;;  %v1923_v13 = vadd.f32 %v603_v11, %v1848_v27 }
 0x2c9   : > { %v1926_v14 = vadd.f32 %v605_v12, %v1850_v28  ;;  %v662_v15 = vmax.f32 %v1917_v8, %v1920_v10 }
 0x2cb   : > { %663 = vmax.xlane.f32.xlu1 %v662_v15  ;;  %v665_v17 = vmax.f32 %v1923_v13, %v1926_v14 }
 0x2cd   : > { %v609_v16 = vpop.f32.mrb[20].mxu1 }
 0x2ce   : > { %v1933_v18 = vadd.f32 %v609_v16, %v1848_v27  ;;  %v611_v19 = vpop.f32.mrb[21].mxu1 }
 0x2cf   : > { %v1936_v20 = vadd.f32 %v611_v19, %v1850_v28  ;;  %666 = vmax.xlane.f32.xlu1 %v665_v17  ;;  %v613_v21 = vpop.f32.mrb[22].mxu1 }
 0x2d0   : > { %v615_v22 = vpop.f32.mrb[23].mxu1  ;;  %v1939_v25 = vadd.f32 %v613_v21, %v1848_v27 }
 0x2d1   : > { %v1942_v26 = vadd.f32 %v615_v22, %v1850_v28  ;;  %v668_v29 = vmax.f32 %v1933_v18, %v1936_v20 }
 0x2d3   : > { %669 = vmax.xlane.f32.xlu1 %v668_v29  ;;  %v671_v33 = vmax.f32 %v1939_v25, %v1942_v26 }
 0x2d5   : > { %v619_v31 = vpop.f32.mrb[24].mxu1 }
 0x2d6   : > { %v1949_v35 = vadd.f32 %v619_v31, %v1848_v27  ;;  %v621_v37 = vpop.f32.mrb[25].mxu1 }
 0x2d7   : > { %v1952_v38 = vadd.f32 %v621_v37, %v1850_v28  ;;  %672 = vmax.xlane.f32.xlu1 %v671_v33  ;;  %v623_v39 = vpop.f32.mrb[26].mxu1 }
 0x2d8   : > { %v1955_v41 = vadd.f32 %v623_v39, %v1848_v27  ;;  %v625_v43 = vpop.f32.mrb[27].mxu1 }
 0x2d9   : > { %v1958_v44 = vadd.f32 %v625_v43, %v1850_v28  ;;  %v674_v47 = vmax.f32 %v1949_v35, %v1952_v38 }
 0x2db   : > { %675 = vmax.xlane.f32.xlu1 %v674_v47  ;;  %v677_v48 = vmax.f32 %v1955_v41, %v1958_v44 }
 0x2dd   : > { %678 = vmax.xlane.f32.xlu0 %v677_v48  ;;  %v629_v49 = vpop.f32.mrb[28].mxu1 }
 0x2de   : > { %v1965_v51 = vadd.f32 %v629_v49, %v1848_v27  ;;  %v631_v53 = vpop.f32.mrb[29].mxu1 }
 0x2df   : > { %v1968_v54 = vadd.f32 %v631_v53, %v1850_v28  ;;  %v633_v57 = vpop.f32.mrb[30].mxu1 }
 0x2e0   : > { %v1971_v58 = vadd.f32 %v633_v57, %v1848_v27  ;;  %v635_v59 = vpop.f32.mrb[31].mxu1  ;;  %v1223_v27 = vld [vmem:[%s1982_s23 + $0x14] ss:$8 sps:$4 sm:$0xff]  }
 0x2e1   : > { %v1974_v61 = vadd.f32 %v635_v59, %v1850_v28  ;;  %v680_v63 = vmax.f32 %v1965_v51, %v1968_v54  ;;  %846 = vmatprep.mubr.bf16.mxu1 %v1223_v27 }
 0x2e3   : > { %681 = vmax.xlane.f32.xlu1 %v680_v63  ;;  %v683_v0 = vmax.f32 %v1971_v58, %v1974_v61 }
 0x2e5   : > { %684 = vmax.xlane.f32.xlu0 %v683_v0 }
 0x338   : > { %v640_v28 = vpop.xlane.xlu0 %639 }
 0x339   : > { %v686_v7 = vsub.f32 %v1853_v30, %v640_v28  ;;  %v687_v9 = vsub.f32 %v1856_v32, %v640_v28 }
 0x33a   : > { %v643_v6 = vpop.xlane.xlu1 %642 }
 0x33b   : > { %v688_v11 = vsub.f32 %v1859_v34, %v643_v6  ;;  %v689_v12 = vsub.f32 %v1862_v36, %v643_v6 }
 0x33d   : > { %v718_v15 = vpack.c.bf16 %v688_v11, %v686_v7  ;;  %v719_v16 = vpack.c.bf16 %v689_v12, %v687_v9 }
 0x33f   : > { %v735_v17 = vmul.bf16 1069105081, %v718_v15  ;;  %v738_v19 = vmul.bf16 1069105081, %v719_v16 }
 0x340   : > { %v646_v21 = vpop.xlane.xlu1 %645 }
 0x341   : > { %1227 = vpow.bf16 %v735_v17  ;;  %v690_v29 = vsub.f32 %v1869_v40, %v646_v21  ;;  %v691_v31 = vsub.f32 %v1872_v42, %v646_v21 }
 0x342   : > { %1229 = vpow.bf16 %v738_v19 }
 0x344   : > { %v649_v22 = vpop.xlane.xlu1 %648 }
 0x345   : > { %v692_v30 = vsub.f32 %v1875_v45, %v649_v22  ;;  %v693_v32 = vsub.f32 %v1878_v46, %v649_v22 }
 0x347   : > { %v720_v33 = vpack.c.bf16 %v692_v30, %v690_v29  ;;  %v721_v34 = vpack.c.bf16 %v693_v32, %v691_v31 }
 0x348   : > { %v652_v37 = vpop.xlane.xlu1 %651 }
 0x349   : > { %v741_v36 = vmul.bf16 1069105081, %v720_v33  ;;  %v744_v39 = vmul.bf16 1069105081, %v721_v34  ;;  %v694_v49 = vsub.f32 %v1885_v50, %v652_v37  ;;  %v695_v40 = vsub.f32 %v1888_v52, %v652_v37 }
 0x34b   : > { %1231 = vpow.bf16 %v741_v36 }
 0x34c   : > { %v1228_v43 = vpop.eup %1227  ;;  %1233 = vpow.bf16 %v744_v39  ;;  %v655_v47 = vpop.xlane.xlu1 %654 }
 0x34d   : > { %v1230_v48 = vpop.eup %1229  ;;  %v696_v42 = vsub.f32 %v1891_v55, %v655_v47  ;;  %v697_v45 = vsub.f32 %v1894_v56, %v655_v47 }
 0x34e   : > { %806 = vmatprep.subr.bf16.mxu0 %v1230_v48  ;;  %1081 = vmatprep.subr.bf16.mxu1 %v1230_v48 }
 0x34f   : > { %v722_v46 = vpack.c.bf16 %v696_v42, %v694_v49  ;;  %v723_v53 = vpack.c.bf16 %v697_v45, %v695_v40  ;;  %807 = vmatpush1.bf16.xpose.msra.mxu0 %v1228_v43  ;;  %1089 = vmatpush1.bf16.xpose.msra.mxu1 %v1228_v43 }
 0x350   : > { %v658_v57 = vpop.xlane.xlu1 %657 }
 0x351   : > { %v747_v59 = vmul.bf16 1069105081, %v722_v46  ;;  %v750_v63 = vmul.bf16 1069105081, %v723_v53  ;;  %v698_v50 = vsub.f32 %v1901_v60, %v658_v57  ;;  %v699_v52 = vsub.f32 %v1904_v62, %v658_v57 }
 0x353   : > { %1235 = vpow.bf16 %v747_v59 }
 0x354   : > { %1237 = vpow.bf16 %v750_v63  ;;  %v661_v0 = vpop.xlane.xlu1 %660 }
 0x355   : > { %v700_v55 = vsub.f32 %v1907_v1, %v661_v0  ;;  %v701_v56 = vsub.f32 %v1910_v4, %v661_v0 }
 0x356   : > { %v1232_v27 = vpop.eup %1231 }
 0x357   : > { %v1234_v5 = vpop.eup %1233  ;;  %v724_v28 = vpack.c.bf16 %v700_v55, %v698_v50  ;;  %v725_v6 = vpack.c.bf16 %v701_v56, %v699_v52  ;;  %v1221_v55 = vld [vmem:[%s1982_s23 + $0x10] ss:$8 sps:$4 sm:$0xff]   ;;  %v1224_v56 = vld [vmem:[%s1982_s23] ss:$8 sps:$4 sm:$0xff]  }
 0x358   : > { %808 = vmatprep.subr.bf16.mxu0 %v1234_v5  ;;  %1082 = vmatprep.subr.bf16.mxu1 %v1234_v5  ;;  %v664_v7 = vpop.xlane.xlu1 %663 }
 0x359   : > { %v753_v9 = vmul.bf16 1069105081, %v724_v28  ;;  %v756_v11 = vmul.bf16 1069105081, %v725_v6  ;;  %809 = vmatpush1.bf16.xpose.msra.mxu0 %v1232_v27  ;;  %1090 = vmatpush1.bf16.xpose.msra.mxu1 %v1232_v27  ;;  %v702_v62 = vsub.f32 %v1917_v8, %v664_v7  ;;  %v703_v1 = vsub.f32 %v1920_v10, %v664_v7 }
 0x35b   : > { %1239 = vpow.bf16 %v753_v9 }
 0x35c   : > { %1241 = vpow.bf16 %v756_v11  ;;  %v667_v60 = vpop.xlane.xlu1 %666 }
 0x35d   : > { %v704_v4 = vsub.f32 %v1923_v13, %v667_v60  ;;  %v705_v12 = vsub.f32 %v1926_v14, %v667_v60 }
 0x35e   : > { %v1236_v15 = vpop.eup %1235 }
 0x35f   : > { %v1238_v16 = vpop.eup %1237  ;;  %v726_v17 = vpack.c.bf16 %v704_v4, %v702_v62  ;;  %v727_v19 = vpack.c.bf16 %v705_v12, %v703_v1  ;;  %v856_v62 = vstv %s854_s6 }
 0x360   : > { %810 = vmatprep.subr.bf16.mxu0 %v1238_v16  ;;  %1083 = vmatprep.subr.bf16.mxu1 %v1238_v16  ;;  %v670_v21 = vpop.xlane.xlu1 %669 }
 0x361   : > { %v759_v22 = vmul.bf16 1069105081, %v726_v17  ;;  %v762_v29 = vmul.bf16 1069105081, %v727_v19  ;;  %811 = vmatpush1.bf16.xpose.msra.mxu0 %v1236_v15  ;;  %1091 = vmatpush1.bf16.xpose.msra.mxu1 %v1236_v15  ;;  %v706_v10 = vsub.f32 %v1933_v18, %v670_v21  ;;  %v707_v13 = vsub.f32 %v1936_v20, %v670_v21 }
 0x363   : > { %1243 = vpow.bf16 %v759_v22 }
 0x364   : > { %1245 = vpow.bf16 %v762_v29  ;;  %v673_v8 = vpop.xlane.xlu1 %672 }
 0x365   : > { %v708_v14 = vsub.f32 %v1939_v25, %v673_v8  ;;  %v709_v31 = vsub.f32 %v1942_v26, %v673_v8 }
 0x366   : > { %v1240_v30 = vpop.eup %1239 }
 0x367   : > { %v1242_v32 = vpop.eup %1241  ;;  %v728_v33 = vpack.c.bf16 %v708_v14, %v706_v10  ;;  %v729_v34 = vpack.c.bf16 %v709_v31, %v707_v13 }
 0x368   : > { %812 = vmatprep.subr.bf16.mxu0 %v1242_v32  ;;  %1084 = vmatprep.subr.bf16.mxu1 %v1242_v32  ;;  %v676_v37 = vpop.xlane.xlu1 %675 }
 0x369   : > { %v765_v36 = vmul.bf16 1069105081, %v728_v33  ;;  %v768_v39 = vmul.bf16 1069105081, %v729_v34  ;;  %813 = vmatpush1.bf16.xpose.msra.mxu0 %v1240_v30  ;;  %1092 = vmatpush1.bf16.xpose.msra.mxu1 %v1240_v30  ;;  %v710_v43 = vsub.f32 %v1949_v35, %v676_v37  ;;  %v711_v20 = vsub.f32 %v1952_v38, %v676_v37 }
 0x36a   : > { %v679_v18 = vpop.xlane.xlu0 %678 }
 0x36b   : > { %1247 = vpow.bf16 %v765_v36  ;;  %v712_v25 = vsub.f32 %v1955_v41, %v679_v18  ;;  %v713_v26 = vsub.f32 %v1958_v44, %v679_v18 }
 0x36c   : > { %1249 = vpow.bf16 %v768_v39 }
 0x36d   : > { %v730_v47 = vpack.c.bf16 %v712_v25, %v710_v43  ;;  %v731_v48 = vpack.c.bf16 %v713_v26, %v711_v20 }
 0x36e   : > { %v1244_v49 = vpop.eup %1243 }
 0x36f   : > { %v1246_v40 = vpop.eup %1245  ;;  %v774_v42 = vmul.bf16 1069105081, %v731_v48  ;;  %v771_v46 = vmul.bf16 1069105081, %v730_v47 }
 0x370   : > { %814 = vmatprep.subr.bf16.mxu0 %v1246_v40  ;;  %1085 = vmatprep.subr.bf16.mxu1 %v1246_v40  ;;  %v682_v45 = vpop.xlane.xlu1 %681 }
 0x371   : > { %815 = vmatpush1.bf16.xpose.msra.mxu0 %v1244_v49  ;;  %1093 = vmatpush1.bf16.xpose.msra.mxu1 %v1244_v49  ;;  %1251 = vpow.bf16 %v774_v42  ;;  %v714_v38 = vsub.f32 %v1965_v51, %v682_v45  ;;  %v715_v41 = vsub.f32 %v1968_v54, %v682_v45 }
 0x372   : > { %v685_v35 = vpop.xlane.xlu0 %684  ;;  %1253 = vpow.bf16 %v771_v46 }
 0x373   : > { %v716_v44 = vsub.f32 %v1971_v58, %v685_v35  ;;  %v717_v53 = vsub.f32 %v1974_v61, %v685_v35 }
 0x375   : > { %v732_v57 = vpack.c.bf16 %v716_v44, %v714_v38  ;;  %v733_v59 = vpack.c.bf16 %v717_v53, %v715_v41 }
 0x376   : > { %v1248_v63 = vpop.eup %1247 }
 0x377   : > { %v1250_v0 = vpop.eup %1249  ;;  %v780_v50 = vmul.bf16 1069105081, %v733_v59  ;;  %v777_v52 = vmul.bf16 1069105081, %v732_v57 }
 0x378   : > { %816 = vmatprep.subr.bf16.mxu0 %v1250_v0  ;;  %1086 = vmatprep.subr.bf16.mxu1 %v1250_v0 }
 0x379   : > { %817 = vmatpush1.bf16.xpose.msra.mxu0 %v1248_v63  ;;  %1094 = vmatpush1.bf16.xpose.msra.mxu1 %v1248_v63  ;;  %1255 = vpow.bf16 %v780_v50 }
 0x37a   : > { %1257 = vpow.bf16 %v777_v52 }
 0x37c   : > { %v1252_v51 = vpop.eup %1251 }
 0x37d   : > { %818 = vmatprep.subr.bf16.mxu0 %v1252_v51  ;;  %1087 = vmatprep.subr.bf16.mxu1 %v1252_v51  ;;  %v1254_v54 = vpop.eup %1253 }
 0x381   : > { %819 = vmatpush1.bf16.xpose.msra.mxu0 %v1254_v54  ;;  %1095 = vmatpush1.bf16.xpose.msra.mxu1 %v1254_v54 }
 0x384   : > { %v1256_v58 = vpop.eup %1255 }
 0x385   : > { %820 = vmatprep.subr.bf16.mxu0 %v1256_v58  ;;  %1088 = vmatprep.subr.bf16.mxu1 %v1256_v58  ;;  %v1258_v61 = vpop.eup %1257 }
 0x389   : > { %821 = vmatpush1.bf16.xpose.msra.mxu0 %v1258_v61  ;;  %1096 = vmatpush1.bf16.xpose.msra.mxu1 %v1258_v61 }
 0x390   : > { %847 = vmatmul.mubr.bf16.vlgmr.msra.gmra.mrb[32].mxu1 %v1221_v55  ;;  %839 = vmatmul.mubr.bf16.vlgmr.msra.gmra.mrb[4].mxu0 %v1224_v56 }
 0x463   : > { %v848_v27 = vpop.f32.mrb[32].mxu1  ;;  %v840_v5 = vpop.f32.mrb[4].mxu0 }
 0x464   : > { %1259 = vrcp.f32 %v848_v27  ;;  %v850_v28 = vpop.f32.mrb[33].mxu1  ;;  %v842_v6 = vpop.f32.mrb[5].mxu0 }
 0x465   : > { %v851_v7 = vpop.f32.mrb[34].mxu1  ;;  %v843_v9 = vpop.f32.mrb[6].mxu0 }
 0x466   : > { %v852_v11 = vpop.f32.mrb[35].mxu1  ;;  %v845_v60 = vpop.f32.mrb[7].mxu0 }
 0x46e   : > { %v1260_v1 = vpop.eup %1259 }
 0x46f   : > { %v857_v4 = vmul.f32 %v1260_v1, %v856_v62 }
 0x471   : > { %v861_v12 = vrot.slane %v857_v4, %v464_v24 }
 0x473   : > { %v862_v15 = vmul.f32 %v861_v12, %v840_v5  ;;  %v863_v16 = vmul.f32 %v861_v12, %v843_v9 }
 0x475   : > { %v864_v17 = vadd.f32 %v862_v15, %v1820_v2  ;;  %v865_v19 = vadd.f32 %v863_v16, %v1822_v3 }
 0x477   : > { %866 = vst [vmem:[%s375_s12] sm:$0xff] %v864_v17  ;;  %867 = vst [vmem:[%s375_s12 + $0x8] sm:$0xff] %v865_v19 }
 0x478   : > { %1364 = shalt.err (!%p1361_p2)
}
 0x479   : > { %s1365_s14 = scalar_lea.hbm %s2031_s29, 256  ;;  %s1369_s23 = scalar_lea.hbm %s2146_s9, 1024 }
 0x47a   : > { %p1366_p10 = scmp.ne.s32.totalorder %s2031_s29, %s1365_s14  ;;  %p1370_p7 = scmp.lt.u32.totalorder %s2031_s29, %s2146_s9 }
 0x47b   : > { %p1371_p1 = scmp.lt.u32.totalorder %s1369_s23, %s1365_s14  ;;  %p1373_p11 = scmp.lt.u32.totalorder %s1365_s14, %s2031_s29 }
 0x47c   : > { %p1367_p4 = pnand %p1366_p10, %p2147_p8 }
 0x47d   : > { %p1372_p5 = por %p1371_p1, %p1370_p7 }
 0x47e   : > { %p1368_p3 = pneg %p1367_p4 }
 0x47f   : > { %p1374_p9 = por %p1373_p11, %p1372_p5 }
 0x481   : > { %p1375_p12 = pnand %p1374_p9, %p1368_p3 }
 0x483   : > { %1378 = shalt.err (!%p1375_p12)
}
 0x484   : > { %s1490_s13 = smov 128   ;;  %s1491_s12 = smov 256  }
 0x485   : > { %s1492_s19 = smov 8  }
 0x486   : > { %1103 = dma.vmem_to_hbm [thread:$0]  (%p2147_p8), %s2026_s20, 256, %s2031_s29, %s869_s16, %s1490_s13, %s1491_s12, %s1492_s19  }
 0x487 PF: > { %s2148_s5 = sld [smem:[#allocation14_spill]]  ;;  %s2149_s18 = sld [smem:[#allocation21_spill]] }
 0x488   : > { %p1120_p0 = scmp.ge.s32.totalorder %s1477_s8, 2 }
 0x48d   : > { %s898_s26 = sand.u32 1, %s2148_s5   ;;  %p2150_p6 = scmp.ne.s32.totalorder %s2149_s18, 0 }
 0x48e   : > { %s899_s17 = scalar_lea.sflag [#allocation5], %s898_s26 }
 0x48f   : > { %p1116_p13 = pnand %p1120_p0, %p2150_p6 }
 0x491   : > { %1432 = dma.done.wait (!%p1116_p13), %s899_s17, 256  }
 0x492   : > { %1434 = vsyncadd (!%p1116_p13), %s899_s17, 4294967040  ;;  %s26_s8 = sadd.s32 1, %s1477_s8   ;;  %s2151_s11 = sld [smem:[#allocation13_spill]] }
 0x493   : > { %p23_p2 = scmp.ge.s32.totalorder %s26_s8, 6   ;;  %s2152_s25 = sld [smem:[#allocation18_spill]] }
 0x494   : > { %s2153_s21 = sld [smem:[#allocation15_spill]]  ;;  %s2154_s28 = sld [smem:[#allocation19_spill]] }
 0x495   : > { %s2155_s15 = sld [smem:[#allocation16_spill]]  ;;  %s2156_s20 = sld [smem:[#allocation17_spill]] }
 0x496   : > { %s2157_s23 = smov %s1441_s24  ;;  %s2159_s26 = smov %s1453_s27 }
 0x497   : > { %s2161_s29 = smov %s1469_s30  ;;  %s2162_s5 = smov %s1473_s7 }
 0x498   : > { %s2158_s24 = smov %s2151_s11  ;;  %25 = sbr.rel (!%p23_p2) target bundleno = 15 (0xf), region = 116 }
 0x49a   : > { %s2160_s27 = smov %s2153_s21 }
 0x49b   : > { %s2163_s30 = smov %s2155_s15  ;;  %s2164_s7 = smov %s2156_s20 }
 0x49f   :  { %904 = vsyncpa [#allocation4], 1 }
 0x4a0   :  { %906 = vsyncpa [#allocation4 + $0x1], 1 }
 0x4a1   :  { %907 = vsyncpa [#allocation7], 1 }
 0x4a2   :  { %909 = vsyncpa [#allocation7 + $0x1], 1 }
 0x4a3   :  { %910 = vsyncpa [#allocation5], 1 }
 0x4a4   :  { %912 = vsyncpa [#allocation5 + $0x1], 1 }

</bundles_post_ra>
